<compile_context>
chip_gen: v6e
topology: v6e:2x2x1
jax: 0.10.0
libtpu: 0.0.40
codegen_flags: <defaults>
</compile_context>

<pallas_src>
import jax
import jax.numpy as jnp
from jax.experimental import pallas as pl
from jax.experimental.pallas import tpu as pltpu

EPS = 1e-5                              # torch.nn.LayerNorm default
VMEM_TILE_BUDGET = 28 * 1024 * 1024     # target double-buffered working set


# --------------------------------------------------------------------------- #
# Kernels
# --------------------------------------------------------------------------- #
def _layer_norm(x, out_dtype):
    """Row-wise LayerNorm statistics in f32 (biased variance), cast to MXU dtype."""
    xf = x.astype(jnp.float32)
    mean = jnp.mean(xf, axis=-1, keepdims=True)
    xc = xf - mean
    var = jnp.mean(xc * xc, axis=-1, keepdims=True)
    return (xc * jax.lax.rsqrt(var + EPS)).astype(out_dtype)


def prenorm_linear_kernel(x_ref, w_ref, b_ref, o_ref):
    """Full-H path: 1-D grid over row tiles; LN computed once per row tile."""
    xn = _layer_norm(x_ref[...], x_ref.dtype)
    y = jnp.dot(xn, w_ref[...], preferred_element_type=jnp.float32)
    o_ref[...] = (y + b_ref[...]).astype(o_ref.dtype)


def prenorm_linear_split_kernel(x_ref, w_ref, b_ref, o_ref, xn_ref):
    """Split-H path: LN cached in VMEM scratch at j == 0, reused for j > 0."""
    @pl.when(pl.program_id(1) == 0)
    def _():
        xn_ref[...] = _layer_norm(x_ref[...], xn_ref.dtype)

    y = jnp.dot(xn_ref[...], w_ref[...], preferred_element_type=jnp.float32)
    o_ref[...] = (y + b_ref[...]).astype(o_ref.dtype)


# --------------------------------------------------------------------------- #
# Tile selection
# --------------------------------------------------------------------------- #
def _round_up(n, m):
    return ((n + m - 1) // m) * m


def _vmem_need(tm, th, D, isz, osz):
    # double-buffered x, W, bias(f32) and output tiles
    return 2 * (tm * D * isz + D * th * isz + th * 4 + tm * th * osz)


def _pick_tile_h(H, target):
    """Largest multiple of 128 that divides H and is <= target, else full H."""
    if H <= target or H % 128 != 0:
        return H
    t = max(128, (target // 128) * 128)
    while t >= 128:
        if H % t == 0:
            return t
        t -= 128
    return H


def _select_tiles(M, D, H, isz, osz, tile_m, tile_h):
    # Row tile: large (amortize per-step overhead), 8-row aligned, 256-aligned
    # when big enough for the v6e/v7x 256x256 MXU.
    tm = _round_up(min(tile_m, _round_up(M, 8)), 8)
    if M >= 512:
        # keep >= 2 row tiles so both v7x TensorCores get work
        while tm > 256 and -(-M // tm) < 2:
            tm //= 2
        if tm >= 256:
            tm = _round_up(tm, 256)

    if tile_h is not None:
        return tm, _pick_tile_h(H, tile_h)

    # Prefer full H (1-D grid, W resident, LN computed once per row tile).
    th = H
    while _vmem_need(tm, th, D, isz, osz) > VMEM_TILE_BUDGET:
        new_th = _pick_tile_h(H, max(128, th // 2))
        if new_th < th:
            th = new_th
        elif tm > 8:
            tm = max(8, _round_up(tm // 2, 8))
        else:
            break
    return tm, th


# --------------------------------------------------------------------------- #
# Wrapper
# --------------------------------------------------------------------------- #
def prenorm(x, gamma, beta, w, bias, *, tile_m=1024, tile_h=None):
    """x: (B, N, D); gamma/beta: (D,); w: (D, H); bias: (H,). Returns (B, N, H).

    tile_h=None (default) prefers the full hidden dim per output tile
    (1-D grid); pass an explicit tile_h to force the split-H path.
    """
    B, N, D = x.shape
    H = w.shape[1]
    M = B * N

    isz = jnp.dtype(x.dtype).itemsize
    osz = isz
    tm, th = _select_tiles(M, D, H, isz, osz, tile_m, tile_h)

    # Fold the LayerNorm affine into the linear layer (exact in f32; one extra
    # low-precision rounding of W' vs. PyTorch's activation-space affine).
    w32 = w.astype(jnp.float32)
    w_folded = (gamma.astype(jnp.float32)[:, None] * w32).astype(x.dtype)
    b_folded = (beta.astype(jnp.float32) @ w32
                + bias.astype(jnp.float32)).reshape(1, H)           # stays f32

    x2 = x.reshape(M, D)

    vmem_need = _vmem_need(tm, th, D, isz, osz)
    vmem_limit = int(min(max(vmem_need + (8 << 20), 32 << 20), 48 << 20))

    num_row_tiles = pl.cdiv(M, tm)

    if th == H:
        grid = (num_row_tiles,)
        in_specs = [
            pl.BlockSpec((tm, D), lambda i: (i, 0)),      # x row tile
            pl.BlockSpec((D, H), lambda i: (0, 0)),       # resident folded W
            pl.BlockSpec((1, H), lambda i: (0, 0)),       # folded bias
        ]
        out_specs = pl.BlockSpec((tm, H), lambda i: (i, 0))
        scratch_shapes = ()
        dim_sem = ("parallel",)
        kernel = prenorm_linear_kernel
    else:
        grid = (num_row_tiles, H // th)
        in_specs = [
            pl.BlockSpec((tm, D), lambda i, j: (i, 0)),   # x tile (held across j)
            pl.BlockSpec((D, th), lambda i, j: (0, j)),   # folded W column tile
            pl.BlockSpec((1, th), lambda i, j: (0, j)),   # folded bias tile
        ]
        out_specs = pl.BlockSpec((tm, th), lambda i, j: (i, j))
        scratch_shapes = (pltpu.VMEM((tm, D), x.dtype),)  # cached normalized tile
        dim_sem = ("parallel", "arbitrary")
        kernel = prenorm_linear_split_kernel

    out = pl.pallas_call(
        kernel,
        out_shape=jax.ShapeDtypeStruct((M, H), x.dtype),
        grid_spec=pltpu.PrefetchScalarGridSpec(
            num_scalar_prefetch=0,
            grid=grid,
            in_specs=in_specs,
            out_specs=out_specs,
            scratch_shapes=scratch_shapes,
        ),
        compiler_params=pltpu.CompilerParams(
            dimension_semantics=dim_sem,
            vmem_limit_bytes=vmem_limit,
        ),
    )(x2, w_folded, b_folded)

    return out.reshape(B, N, H)


def prenorm_ref(x, gamma, beta, w, bias):
    """Pure-JAX reference with PyTorch PreNorm(LayerNorm -> Linear) semantics."""
    xf = x.astype(jnp.float32)
    mean = jnp.mean(xf, axis=-1, keepdims=True)
    var = jnp.mean((xf - mean) ** 2, axis=-1, keepdims=True)
    xn = (xf - mean) * jax.lax.rsqrt(var + EPS)
    xn = xn * gamma.astype(jnp.float32) + beta.astype(jnp.float32)
    y = xn @ w.astype(jnp.float32) + bias.astype(jnp.float32)
    return y.astype(x.dtype)


if __name__ == "__main__":
    key = jax.random.PRNGKey(0)

    # --- Test 1: small f32 shapes, full-H (1-D grid) path ---
    B, N, D, H = 2, 8, 32, 32
    k1, k2, k3, k4, key = jax.random.split(key, 5)
    x = jax.random.normal(k1, (B, N, D), jnp.float32)
    gamma = 1.0 + 0.1 * jax.random.normal(k2, (D,), jnp.float32)
    beta = 0.1 * jax.random.normal(k3, (D,), jnp.float32)
    w = 0.02 * jax.random.normal(k4, (D, H), jnp.float32)
    bias = jnp.linspace(-0.1, 0.1, H, dtype=jnp.float32)

    y = prenorm(x, gamma, beta, w, bias)
    jax.block_until_ready(y)
    y_ref = prenorm_ref(x, gamma, beta, w, bias)
    assert jnp.allclose(y, y_ref, atol=1e-4, rtol=1e-4), "f32 mismatch vs reference"

    # --- Test 2: bf16, token count not tile-aligned, auto tiling (full H,
    #     single partial row block handled by Pallas edge masking) ---
    B, N, D, H = 2, 50, 128, 256
    k1, k2, k3, k4, key = jax.random.split(key, 5)
    x = jax.random.normal(k1, (B, N, D), jnp.float32).astype(jnp.bfloat16)
    gamma = (1.0 + 0.1 * jax.random.normal(k2, (D,), jnp.float32)).astype(jnp.bfloat16)
    beta = (0.1 * jax.random.normal(k3, (D,), jnp.float32)).astype(jnp.bfloat16)
    w = (0.05 * jax.random.normal(k4, (D, H), jnp.float32)).astype(jnp.bfloat16)
    bias = jnp.zeros((H,), jnp.bfloat16)
    y_ref32 = prenorm_ref(x, gamma, beta, w, bias).astype(jnp.float32)

    y = prenorm(x, gamma, beta, w, bias)
    jax.block_until_ready(y)
    err = jnp.max(jnp.abs(y.astype(jnp.float32) - y_ref32))
    assert err < 5e-2, f"bf16 (full-H) mismatch vs reference (max abs err {err})"

    # --- Test 3: force the split-H fallback (scratch-cached LayerNorm, 2-D grid) ---
    y = prenorm(x, gamma, beta, w, bias, tile_m=64, tile_h=128)
    jax.block_until_ready(y)
    err = jnp.max(jnp.abs(y.astype(jnp.float32) - y_ref32))
    assert err < 5e-2, f"bf16 (split-H) mismatch vs reference (max abs err {err})"

    print("KERNEL_OK")
</pallas_src>

<mosaic_0001>
module attributes {stable_mosaic.version = 11 : i64} {
  func.func @prenorm_linear_kernel(%arg0: i32, %arg1: memref<16x32xf32, #tpu.memory_space<vmem>>, %arg2: memref<32x32xf32, #tpu.memory_space<vmem>>, %arg3: memref<1x32xf32, #tpu.memory_space<vmem>>, %arg4: memref<16x32xf32, #tpu.memory_space<vmem>>) attributes {dimension_semantics = [#tpu.dimension_semantics<parallel>], iteration_bounds = array<i64: 1>, scalar_prefetch = 0 : i64, scratch_operands = 0 : i64, tpu.core_type = #tpu.core_type<tc>, window_params = [{transform_indices = @transform_0, window_bounds = array<i64: 16, 32>}, {pipeline_mode = #tpu.pipeline_mode<synchronous>, transform_indices = @transform_1, window_bounds = array<i64: 32, 32>}, {pipeline_mode = #tpu.pipeline_mode<synchronous>, transform_indices = @transform_2, window_bounds = array<i64: 1, 32>}, {transform_indices = @transform_3, window_bounds = array<i64: 16, 32>}]} {
    %c0 = arith.constant 0 : index
    %c0_0 = arith.constant 0 : index
    %0 = vector.load %arg1[%c0, %c0_0] : memref<16x32xf32, #tpu.memory_space<vmem>>, vector<16x32xf32>
    %cst = arith.constant dense<0.000000e+00> : vector<16xf32>
    %1 = vector.multi_reduction <add>, %0, %cst [1] : vector<16x32xf32> to vector<16xf32>
    %2 = vector.shape_cast %1 : vector<16xf32> to vector<16x1xf32>
    %cst_1 = arith.constant 3.200000e+01 : f32
    %3 = vector.broadcast %cst_1 : f32 to vector<16x1xf32>
    %4 = arith.divf %2, %3 : vector<16x1xf32>
    %5 = vector.broadcast %4 : vector<16x1xf32> to vector<16x32xf32>
    %6 = arith.subf %0, %5 : vector<16x32xf32>
    %7 = arith.mulf %6, %6 : vector<16x32xf32>
    %cst_2 = arith.constant dense<0.000000e+00> : vector<16xf32>
    %8 = vector.multi_reduction <add>, %7, %cst_2 [1] : vector<16x32xf32> to vector<16xf32>
    %9 = vector.shape_cast %8 : vector<16xf32> to vector<16x1xf32>
    %cst_3 = arith.constant 3.200000e+01 : f32
    %10 = vector.broadcast %cst_3 : f32 to vector<16x1xf32>
    %11 = arith.divf %9, %10 : vector<16x1xf32>
    %cst_4 = arith.constant 9.99999974E-6 : f32
    %12 = vector.broadcast %cst_4 : f32 to vector<16x1xf32>
    %13 = arith.addf %11, %12 : vector<16x1xf32>
    %14 = math.rsqrt %13 : vector<16x1xf32>
    %15 = vector.broadcast %14 : vector<16x1xf32> to vector<16x32xf32>
    %16 = arith.mulf %6, %15 : vector<16x32xf32>
    %c0_5 = arith.constant 0 : index
    %c0_6 = arith.constant 0 : index
    %17 = vector.load %arg2[%c0_5, %c0_6] : memref<32x32xf32, #tpu.memory_space<vmem>>, vector<32x32xf32>
    %cst_7 = arith.constant dense<0.000000e+00> : vector<16x32xf32>
    %18 = tpu.matmul %16, %17, %cst_7 {dimension_numbers = #tpu.dot_dimension_numbers<[1], [0], [0], [1], [0, 0, 1, 1], [], []>} : vector<16x32xf32>, vector<32x32xf32>, vector<16x32xf32> -> vector<16x32xf32>
    %c0_8 = arith.constant 0 : index
    %c0_9 = arith.constant 0 : index
    %19 = vector.load %arg3[%c0_8, %c0_9] : memref<1x32xf32, #tpu.memory_space<vmem>>, vector<1x32xf32>
    %20 = vector.broadcast %19 : vector<1x32xf32> to vector<16x32xf32>
    %21 = arith.addf %18, %20 : vector<16x32xf32>
    %c0_10 = arith.constant 0 : index
    %c0_11 = arith.constant 0 : index
    %22 = vector.load %arg4[%c0_10, %c0_11] : memref<16x32xf32, #tpu.memory_space<vmem>>, vector<16x32xf32>
    tpu.vector_store %arg4[%c0_10, %c0_11], %21 {strides = array<i32>} : memref<16x32xf32, #tpu.memory_space<vmem>>, vector<16x32xf32>,
    return
  }
  func.func @transform_0(%arg0: i32) -> (i32, i32) {
    %c0_i32 = arith.constant 0 : i32
    %c0_i32_0 = arith.constant 0 : i32
    return %arg0, %c0_i32 : i32, i32
  }
  func.func @transform_1(%arg0: i32) -> (i32, i32) {
    %c0_i32 = arith.constant 0 : i32
    %c0_i32_0 = arith.constant 0 : i32
    %c0_i32_1 = arith.constant 0 : i32
    return %c0_i32, %c0_i32_0 : i32, i32
  }
  func.func @transform_2(%arg0: i32) -> (i32, i32) {
    %c0_i32 = arith.constant 0 : i32
    %c0_i32_0 = arith.constant 0 : i32
    %c0_i32_1 = arith.constant 0 : i32
    return %c0_i32, %c0_i32_0 : i32, i32
  }
  func.func @transform_3(%arg0: i32) -> (i32, i32) {
    %c0_i32 = arith.constant 0 : i32
    %c0_i32_0 = arith.constant 0 : i32
    return %arg0, %c0_i32 : i32, i32
  }
}

</mosaic_0001>

<bundles_post_ra>
// kernel: tpu_custom_call.1
= control target key start
LH: loop header
LB: loop body
LE: loop exit
PB: predicated region body
PF: predicated region fallthrough
CT: control target
= control target key end

     0   :  { %8 = vsyncpa [#allocation3], 0  ;;  %s334_s0 = inlined_call_operand.hbm [shape: f32[16,32], index: 0, kind: input, shape index: {}]   ;;  %s335_s1 = inlined_call_operand.hbm [shape: f32[32,32], index: 1, kind: input, shape index: {}]   ;;  %s336_s2 = inlined_call_operand.vmem [shape: f32[1,32], index: 2, kind: input, shape index: {}]   ;;  %s337_s3 = inlined_call_operand.hbm [shape: f32[16,32], index: 3, kind: output, shape index: {}]  }
   0x1   :  { %9 = vsyncpa [#allocation6], 0 }
   0x2   :  { %10 = vsyncpa [#allocation4], 0  ;;  %s280_s12 = smov [#allocation2]  }
   0x3   :  { %s16_s13 = sshll.u32 %s280_s12, 4  ;;  %s17_s13 = int_to_ptr.vmem [resolvable:$true] %s16_s13 }
   0x4   :  { %s222_s14 = scalar_lea.vmem %s17_s13, 256  ;;  %p227_p1 = scmp.lt.s32.totalorder %s17_s13, %s17_s13 }
   0x5   :  { %p223_p0 = scmp.ne.s32.totalorder %s17_s13, %s222_s14  ;;  %p228_p2 = scmp.lt.s32.totalorder %s222_s14, %s222_s14 }
   0x7   :  { %p229_p3 = por %p228_p2, %p227_p1 }
   0x9   :  { %p230_p4 = pnand %p229_p3, %p223_p0 }
   0xb   :  { %233 = shalt.err (!%p230_p4)
}
   0xc   :  { %s281_s15 = smov 128   ;;  %s282_s16 = smov 8  }
   0xd   :  { %22 = dma.hbm_to_vmem [thread:$0]  %s334_s0, 256, %s17_s13, [#allocation3], %s281_s15, %s281_s15, %s282_s16  }
   0xe   :  { %s283_s19 = smov [#allocation5]  }
   0xf   :  { %s28_s20 = sshll.u32 %s283_s19, 4  ;;  %s29_s20 = int_to_ptr.vmem [resolvable:$true] %s28_s20 }
  0x10   :  { %s242_s21 = scalar_lea.vmem %s29_s20, 512  ;;  %p247_p6 = scmp.lt.s32.totalorder %s29_s20, %s29_s20 }
  0x11   :  { %p243_p5 = scmp.ne.s32.totalorder %s29_s20, %s242_s21  ;;  %p248_p7 = scmp.lt.s32.totalorder %s242_s21, %s242_s21 }
  0x13   :  { %p249_p8 = por %p248_p7, %p247_p6 }
  0x15   :  { %p250_p9 = pnand %p249_p8, %p243_p5 }
  0x17   :  { %253 = shalt.err (!%p250_p9)
}
  0x18   :  { %34 = dma.hbm_to_vmem [thread:$0]  %s335_s1, 512, %s29_s20, [#allocation6], %s281_s15, %s281_s15, %s282_s16  }
  0x19   :  { %274 = dma.done.wait [#allocation3], 256  }
  0x1a   :  { %275 = vsyncadd [#allocation3], 4294967040 }
  0x1b   :  { %276 = dma.done.wait [#allocation6], 512  }
  0x1c   :  { %277 = vsyncadd [#allocation6], 4294966784  ;;  %vm45_vm0 = vcmask 261120   ;;  %v43_v0 = vld [vmem:[#allocation2] sm:$0xff]  ;;  %v44_v1 = vld [vmem:[#allocation2 + $0x8] sm:$0xff]  ;;  %s284_s24 = smov [#allocation7]  }
  0x1d   :  { %v46_v2 = vsel %vm45_vm0, %v43_v0, 0.0  ;;  %v49_v3 = vsel %vm45_vm0, %v44_v1, 0.0  ;;  %v76_v14 = vld [vmem:[#allocation5 + $0x18] sm:$0xff]  ;;  %v75_v15 = vld [vmem:[#allocation5 + $0x10] sm:$0xff]  ;;  %v74_v16 = vld [vmem:[#allocation5 + $0x8] sm:$0xff]  ;;  %s172_s25 = sshll.u32 %s284_s24, 4  ;;  %s173_s25 = int_to_ptr.vmem [resolvable:$true] %s172_s25 }
  0x1e   :  { %47 = vadd.xlane.f32.xlu0 %v46_v2  ;;  %194 = vmatprep.subr.mxu0 %v76_v14  ;;  %v73_v17 = vld [vmem:[#allocation5] sm:$0xff]  ;;  %v185_v28 = vld [vmem:[%s336_s2] ss:$0 sm:$0xff]  ;;  %s254_s26 = scalar_lea.vmem %s173_s25, 256  ;;  %p259_p11 = scmp.lt.s32.totalorder %s173_s25, %s173_s25 }
  0x1f   :  { %195 = vmatpush3.msra.mxu0 %v76_v14  ;;  %p255_p10 = scmp.ne.s32.totalorder %s173_s25, %s254_s26  ;;  %p260_p12 = scmp.lt.s32.totalorder %s254_s26, %s254_s26 }
  0x20   :  { %196 = vmatprep.subr.mxu0 %v75_v15 }
  0x21   :  { %197 = vmatpush3.msra.mxu0 %v75_v15  ;;  %p261_p13 = por %p260_p12, %p259_p11 }
  0x22   :  { %50 = vadd.xlane.f32.xlu0 %v49_v3  ;;  %198 = vmatprep.subr.mxu0 %v74_v16 }
  0x23   :  { %199 = vmatpush3.msra.mxu0 %v74_v16  ;;  %p262_p0 = pnand %p261_p13, %p255_p10 }
  0x24   :  { %200 = vmatprep.subr.mxu0 %v73_v17 }
  0x25   :  { %201 = vmatpush3.msra.mxu0 %v73_v17 }
  0xa7   :  { %v48_v4 = vpop.xlane.xlu0 %47 }
  0xa8   :  { %v53_v5 = vmul.f32 0.03125, %v48_v4 }
  0xaa   :  { %v55_v6 = vsub.f32 %v43_v0, %v53_v5 }
  0xab   :  { %v51_v7 = vpop.xlane.xlu0 %50 }
  0xac   :  { %v54_v8 = vmul.f32 0.03125, %v51_v7  ;;  %v57_v9 = vmul.f32 %v55_v6, %v55_v6 }
  0xae   :  { %v56_v10 = vsub.f32 %v44_v1, %v54_v8  ;;  %v59_v11 = vsel %vm45_vm0, %v57_v9, 0.0 }
  0xaf   :  { %60 = vadd.xlane.f32.xlu1 %v59_v11 }
  0xb0   :  { %v58_v12 = vmul.f32 %v56_v10, %v56_v10 }
  0xb2   :  { %v62_v13 = vsel %vm45_vm0, %v58_v12, 0.0 }
  0xb3   :  { %63 = vadd.xlane.f32.xlu1 %v62_v13 }
 0x138   :  { %v61_v18 = vpop.xlane.xlu1 %60 }
 0x139   :  { %v65_v19 = vmul.f32 0.03125, %v61_v18 }
 0x13b   :  { %v67_v20 = vadd.f32 1e-05, %v65_v19 }
 0x13c   :  { %v64_v21 = vpop.xlane.xlu1 %63 }
 0x13d   :  { %210 = vrsqrt.f32 %v67_v20  ;;  %v66_v22 = vmul.f32 0.03125, %v64_v21 }
 0x13f   :  { %v68_v23 = vadd.f32 1e-05, %v66_v22 }
 0x141   :  { %212 = vrsqrt.f32 %v68_v23 }
 0x14a   :  { %v211_v24 = vpop.eup %210 }
 0x14b   :  { %v71_v25 = vmul.f32 %v211_v24, %v55_v6 }
 0x14d   :  { %202 = vmatprep.mubr.msk.f32.mxu0 %vm45_vm0, %v71_v25 }
 0x14e   :  { %v213_v26 = vpop.eup %212 }
 0x14f   :  { %v72_v27 = vmul.f32 %v213_v26, %v56_v10 }
 0x151   :  { %203 = vmatmul.mubr.msk.f32.vlgmr.msra.gmra.mxu0 %vm45_vm0, %v72_v27 }
 0x211   :  { %v204_v29 = vpop.f32.mrf.mxu0 }
 0x212   :  { %v162_v30 = vadd.f32 %v204_v29, %v185_v28 }
 0x213   :  { %v156_v31 = vpop.f32.mrf.mxu0 }
 0x214   :  { %166 = vst.msk [vmem:[#allocation7 + $0x8] sm:$0xff] %vm45_vm0, %v162_v30  ;;  %v157_v32 = vadd.f32 %v185_v28, %v156_v31 }
 0x216   :  { %165 = vst.msk [vmem:[#allocation7] sm:$0xff] %vm45_vm0, %v157_v32 }
 0x217   :  { %265 = shalt.err (!%p262_p0)
}
 0x218   :  { %178 = dma.vmem_to_hbm [thread:$0]  %s173_s25, 256, %s337_s3, [#allocation4], %s281_s15, %s281_s15, %s282_s16  }
 0x219   :  { %278 = dma.done.wait [#allocation4], 256  }
 0x21a   :  { %279 = vsyncadd [#allocation4], 4294967040 }
 0x21b   :  { %182 = vsyncpa [#allocation3], 1 }
 0x21c   :  { %183 = vsyncpa [#allocation6], 1 }
 0x21d   :  { %184 = vsyncpa [#allocation4], 1 }

</bundles_post_ra>
